<compile_context>
chip_gen: v6e
topology: v6e:2x2x1
jax: 0.10.0
libtpu: 0.0.40
codegen_flags: <defaults>
</compile_context>

<pallas_src>
import functools

import numpy as np

import jax
import jax.numpy as jnp
from jax.experimental import pallas as pl
from jax.experimental.pallas import tpu as pltpu


# ---------------------------------------------------------------------------
# Tiling configuration
# ---------------------------------------------------------------------------

# ~10 MiB of (VMEM-padded) in+out buffers per grid step; double-buffered by
# the Pallas pipeline -> ~20 MiB, under the explicit scoped-VMEM limit below
# and under every generation's physical VMEM (v7x: 64 MiB/TC, v5e/v6e: 128).
_BLOCK_BUDGET_BYTES = 10 * 1024 * 1024
_VMEM_LIMIT_BYTES = 28 * 1024 * 1024


def _round_up(x, m):
    return ((x + m - 1) // m) * m


def _pick_blocks(B, H, W, buf_descs, budget=_BLOCK_BUDGET_BYTES):
    """Choose (batch_block, h_block) for blocks shaped (tB, [nc,] tH, W).

    buf_descs: list of (n_channels, itemsize, sublane_quantum), one per VMEM
    buffer of a grid step; the cost model includes the (sublane, 128-lane)
    padding Mosaic applies to the last two dims.  tH is always a multiple of
    8 or the full H so the BlockSpecs stay legal; grid remainders (ragged
    last blocks) are masked by Pallas, never padded/sliced by us.
    """
    wp = _round_up(W, 128)

    def cost(tb, th):
        total = 0
        for nc, itemsize, subl in buf_descs:
            total += tb * nc * _round_up(th, subl) * wp * itemsize
        return total

    th = H if H <= 8 else 8
    tb = 1
    while th < H:
        nxt = min(H, th * 2)
        if cost(tb, nxt) > budget:
            break
        th = nxt
    while tb < B:
        nxt = min(B, tb * 2)
        if cost(nxt, th) > budget:
            break
        tb = nxt
    return tb, th, cost(tb, th)


# ---------------------------------------------------------------------------
# Kernels
# ---------------------------------------------------------------------------

def _unpack_rgba_kernel(x_ref, o_ref, *, shifts):
    """One 32-bit word per pixel (4 packed uint8 channels) -> float CHW / 255."""
    u = x_ref[...][:, None, :, :]                       # (tB, 1, tH, W) int32
    for c, shift in enumerate(shifts):
        byte = (u >> shift) & 0xFF                      # channel byte, in [0, 255]
        val = byte.astype(jnp.float32) * jnp.float32(1.0 / 255.0)
        o_ref[:, c:c + 1, :, :] = val.astype(o_ref.dtype)


def _scale_kernel(x_ref, o_ref):
    """uint8 -> float in [0, 1]; NHWC->NCHW relayout already done outside."""
    o_ref[...] = (x_ref[...].astype(jnp.float32)
                  * jnp.float32(1.0 / 255.0)).astype(o_ref.dtype)


# ---------------------------------------------------------------------------
# Wrappers
# ---------------------------------------------------------------------------

_CHANNEL_SHIFTS = None


def _channel_byte_shifts():
    """Bit offset of each HWC channel inside a packed 4x-uint8 32-bit word.

    Determined once with a tiny on-device probe so the kernel stays correct
    regardless of the bitcast byte-order convention.
    """
    global _CHANNEL_SHIFTS
    if _CHANNEL_SHIFTS is None:
        word = int(jax.device_get(jax.lax.bitcast_convert_type(
            jnp.array([[1, 2, 3, 4]], dtype=jnp.uint8), jnp.uint32))[0])
        _CHANNEL_SHIFTS = tuple(
            next(s for s in (0, 8, 16, 24) if (word >> s) & 0xFF == c + 1)
            for c in range(4))
    return _CHANNEL_SHIFTS


@functools.partial(jax.jit, static_argnames=("shifts", "out_dtype"))
def _to_tensor_nhwc4(x_u8, *, shifts, out_dtype):
    """Single-pass C == 4 path: read u8 NHWC once, write float NCHW once."""
    B, H, W, C = x_u8.shape
    out_isz = np.dtype(out_dtype).itemsize
    # Reinterpret the 4 uint8 channels of each pixel as one 32-bit word
    # (bitcast; no widening pass, no transpose pass).
    x_px = jax.lax.bitcast_convert_type(x_u8, jnp.int32)          # (B, H, W)

    tb, th, block_cost = _pick_blocks(
        B, H, W,
        buf_descs=[(1, 4, 8),            # packed int32 pixel words (input block)
                   (4, out_isz, 8)])     # float NCHW output block
    grid = (pl.cdiv(B, tb), pl.cdiv(H, th))

    return pl.pallas_call(
        functools.partial(_unpack_rgba_kernel, shifts=shifts),
        out_shape=jax.ShapeDtypeStruct((B, 4, H, W), out_dtype),
        grid=grid,
        in_specs=[pl.BlockSpec((tb, th, W), lambda b, h: (b, h, 0))],
        out_specs=pl.BlockSpec((tb, 4, th, W), lambda b, h: (b, 0, h, 0)),
        compiler_params=pltpu.CompilerParams(
            dimension_semantics=("parallel", "parallel"),
            vmem_limit_bytes=max(_VMEM_LIMIT_BYTES, 2 * block_cost + (4 << 20)),
        ),
    )(x_px)


@functools.partial(jax.jit, static_argnames=("out_dtype",))
def _to_tensor_general(x_u8, *, out_dtype):
    """General-C path: fused XLA byte transpose (NHWC->NCHW) + streaming convert."""
    B, H, W, C = x_u8.shape
    out_isz = np.dtype(out_dtype).itemsize
    # Byte-level layout move (1 B read + 1 B write).  For tiny channel counts
    # an in-kernel (HW, C) -> (C, HW) transpose would be XLU-bound, so the
    # relayout deliberately stays in XLA; the expensive widen+scale (4 B/elem
    # writeback) is what the Pallas kernel owns.
    x_nchw = jnp.transpose(x_u8, (0, 3, 1, 2))                    # (B, C, H, W) u8

    tb, th, block_cost = _pick_blocks(
        B, H, W,
        buf_descs=[(C, 1, 32),           # uint8 NCHW input block (32-row packing)
                   (C, out_isz, 8)])     # float NCHW output block
    grid = (pl.cdiv(B, tb), pl.cdiv(H, th))

    return pl.pallas_call(
        _scale_kernel,
        out_shape=jax.ShapeDtypeStruct((B, C, H, W), out_dtype),
        grid=grid,
        in_specs=[pl.BlockSpec((tb, C, th, W), lambda b, h: (b, 0, h, 0))],
        out_specs=pl.BlockSpec((tb, C, th, W), lambda b, h: (b, 0, h, 0)),
        compiler_params=pltpu.CompilerParams(
            dimension_semantics=("parallel", "parallel"),
            vmem_limit_bytes=max(_VMEM_LIMIT_BYTES, 2 * block_cost + (4 << 20)),
        ),
    )(x_nchw)


def base_augment_to_tensor(x_u8, out_dtype=jnp.float32):
    """BaseAugmentModule.to_tensor: uint8 NHWC [0,255] -> float NCHW [0.0,1.0].

    out_dtype=jnp.bfloat16 halves the writeback traffic for consumers that
    accept it; the float32 default preserves exact ToTensor semantics.
    """
    if x_u8.ndim != 4:
        raise ValueError(f"expected NHWC input, got shape {x_u8.shape}")
    if x_u8.dtype != jnp.uint8:
        x_u8 = x_u8.astype(jnp.uint8)
    if x_u8.shape[-1] == 4:
        return _to_tensor_nhwc4(x_u8, shifts=_channel_byte_shifts(),
                                out_dtype=out_dtype)
    return _to_tensor_general(x_u8, out_dtype=out_dtype)


# TODO(synk): `forward` and `_augmentation_space` are @abstractmethod in the
# PyTorch module (no concrete math to lower); `transforms`, `interpolation`
# and `fill` are stored config consumed only by subclasses.


if __name__ == "__main__":
    key = jax.random.PRNGKey(0)

    def _check(shape, out_dtype=jnp.float32, atol=1e-6):
        B, H, W, C = shape
        k = jax.random.fold_in(key, B * 1000 + H * 100 + W * 10 + C)
        x_u8 = jax.random.randint(k, shape, 0, 256, dtype=jnp.int32).astype(jnp.uint8)

        out = base_augment_to_tensor(x_u8, out_dtype=out_dtype)
        out = jax.block_until_ready(out)

        # Reference: torchvision ToTensor semantics (HWC [0,255] -> CHW [0,1]).
        ref = jnp.transpose(x_u8.astype(jnp.float32) / 255.0, (0, 3, 1, 2))

        assert out.shape == (B, C, H, W), out.shape
        assert out.dtype == out_dtype, out.dtype
        err = float(jnp.max(jnp.abs(out.astype(jnp.float32) - ref)))
        assert err <= atol, err
        assert float(out.min()) >= 0.0 and float(out.max()) <= 1.0

    # Fused single-pass path (C == 4, packed-pixel kernel).
    _check((2, 16, 16, 4))
    # General path: RGB, odd spatial sizes (sub-128 lane width, full-extent blocks).
    _check((1, 7, 9, 3))
    # General path: multi-batch RGB.
    _check((3, 32, 32, 3))
    # Optional bf16 output (half the writeback bytes; looser tolerance).
    _check((2, 16, 16, 4), out_dtype=jnp.bfloat16, atol=5e-3)

    print("KERNEL_OK")
</pallas_src>

<mosaic_0001>
module attributes {stable_mosaic.version = 11 : i64} {
  func.func @_unpack_rgba_kernel(%arg0: i32, %arg1: i32, %arg2: memref<2x16x16xi32, #tpu.memory_space<vmem>>, %arg3: memref<2x4x16x16xf32, #tpu.memory_space<vmem>>) attributes {dimension_semantics = [#tpu.dimension_semantics<parallel>, #tpu.dimension_semantics<parallel>], iteration_bounds = array<i64: 1, 1>, scalar_prefetch = 0 : i64, scratch_operands = 0 : i64, tpu.core_type = #tpu.core_type<tc>, window_params = [{transform_indices = @transform_0, window_bounds = array<i64: 2, 16, 16>}, {transform_indices = @transform_1, window_bounds = array<i64: 2, 4, 16, 16>}]} {
    %c0 = arith.constant 0 : index
    %c0_0 = arith.constant 0 : index
    %c0_1 = arith.constant 0 : index
    %0 = vector.load %arg2[%c0, %c0_0, %c0_1] : memref<2x16x16xi32, #tpu.memory_space<vmem>>, vector<2x16x16xi32>
    %1 = vector.shape_cast %0 : vector<2x16x16xi32> to vector<2x1x16x16xi32>
    %c0_i32 = arith.constant 0 : i32
    %2 = vector.broadcast %c0_i32 : i32 to vector<2x1x16x16xi32>
    %3 = arith.shrsi %1, %2 : vector<2x1x16x16xi32>
    %c255_i32 = arith.constant 255 : i32
    %4 = vector.broadcast %c255_i32 : i32 to vector<2x1x16x16xi32>
    %5 = arith.andi %3, %4 : vector<2x1x16x16xi32>
    %6 = arith.sitofp %5 : vector<2x1x16x16xi32> to vector<2x1x16x16xf32>
    %cst = arith.constant 0.00392156886 : f32
    %7 = vector.broadcast %cst : f32 to vector<2x1x16x16xf32>
    %8 = arith.mulf %6, %7 : vector<2x1x16x16xf32>
    %c0_2 = arith.constant 0 : index
    %c0_3 = arith.constant 0 : index
    %c0_4 = arith.constant 0 : index
    %c0_5 = arith.constant 0 : index
    %9 = vector.load %arg3[%c0_2, %c0_3, %c0_4, %c0_5] : memref<2x4x16x16xf32, #tpu.memory_space<vmem>>, vector<2x1x16x16xf32>
    tpu.vector_store %arg3[%c0_2, %c0_3, %c0_4, %c0_5], %8 {strides = array<i32>} : memref<2x4x16x16xf32, #tpu.memory_space<vmem>>, vector<2x1x16x16xf32>,
    %c8_i32 = arith.constant 8 : i32
    %10 = vector.broadcast %c8_i32 : i32 to vector<2x1x16x16xi32>
    %11 = arith.shrsi %1, %10 : vector<2x1x16x16xi32>
    %c255_i32_6 = arith.constant 255 : i32
    %12 = vector.broadcast %c255_i32_6 : i32 to vector<2x1x16x16xi32>
    %13 = arith.andi %11, %12 : vector<2x1x16x16xi32>
    %14 = arith.sitofp %13 : vector<2x1x16x16xi32> to vector<2x1x16x16xf32>
    %cst_7 = arith.constant 0.00392156886 : f32
    %15 = vector.broadcast %cst_7 : f32 to vector<2x1x16x16xf32>
    %16 = arith.mulf %14, %15 : vector<2x1x16x16xf32>
    %c0_8 = arith.constant 0 : index
    %c1 = arith.constant 1 : index
    %c0_9 = arith.constant 0 : index
    %c0_10 = arith.constant 0 : index
    %17 = vector.load %arg3[%c0_8, %c1, %c0_9, %c0_10] : memref<2x4x16x16xf32, #tpu.memory_space<vmem>>, vector<2x1x16x16xf32>
    tpu.vector_store %arg3[%c0_8, %c1, %c0_9, %c0_10], %16 {strides = array<i32>} : memref<2x4x16x16xf32, #tpu.memory_space<vmem>>, vector<2x1x16x16xf32>,
    %c16_i32 = arith.constant 16 : i32
    %18 = vector.broadcast %c16_i32 : i32 to vector<2x1x16x16xi32>
    %19 = arith.shrsi %1, %18 : vector<2x1x16x16xi32>
    %c255_i32_11 = arith.constant 255 : i32
    %20 = vector.broadcast %c255_i32_11 : i32 to vector<2x1x16x16xi32>
    %21 = arith.andi %19, %20 : vector<2x1x16x16xi32>
    %22 = arith.sitofp %21 : vector<2x1x16x16xi32> to vector<2x1x16x16xf32>
    %cst_12 = arith.constant 0.00392156886 : f32
    %23 = vector.broadcast %cst_12 : f32 to vector<2x1x16x16xf32>
    %24 = arith.mulf %22, %23 : vector<2x1x16x16xf32>
    %c0_13 = arith.constant 0 : index
    %c2 = arith.constant 2 : index
    %c0_14 = arith.constant 0 : index
    %c0_15 = arith.constant 0 : index
    %25 = vector.load %arg3[%c0_13, %c2, %c0_14, %c0_15] : memref<2x4x16x16xf32, #tpu.memory_space<vmem>>, vector<2x1x16x16xf32>
    tpu.vector_store %arg3[%c0_13, %c2, %c0_14, %c0_15], %24 {strides = array<i32>} : memref<2x4x16x16xf32, #tpu.memory_space<vmem>>, vector<2x1x16x16xf32>,
    %c24_i32 = arith.constant 24 : i32
    %26 = vector.broadcast %c24_i32 : i32 to vector<2x1x16x16xi32>
    %27 = arith.shrsi %1, %26 : vector<2x1x16x16xi32>
    %c255_i32_16 = arith.constant 255 : i32
    %28 = vector.broadcast %c255_i32_16 : i32 to vector<2x1x16x16xi32>
    %29 = arith.andi %27, %28 : vector<2x1x16x16xi32>
    %30 = arith.sitofp %29 : vector<2x1x16x16xi32> to vector<2x1x16x16xf32>
    %cst_17 = arith.constant 0.00392156886 : f32
    %31 = vector.broadcast %cst_17 : f32 to vector<2x1x16x16xf32>
    %32 = arith.mulf %30, %31 : vector<2x1x16x16xf32>
    %c0_18 = arith.constant 0 : index
    %c3 = arith.constant 3 : index
    %c0_19 = arith.constant 0 : index
    %c0_20 = arith.constant 0 : index
    %33 = vector.load %arg3[%c0_18, %c3, %c0_19, %c0_20] : memref<2x4x16x16xf32, #tpu.memory_space<vmem>>, vector<2x1x16x16xf32>
    tpu.vector_store %arg3[%c0_18, %c3, %c0_19, %c0_20], %32 {strides = array<i32>} : memref<2x4x16x16xf32, #tpu.memory_space<vmem>>, vector<2x1x16x16xf32>,
    return
  }
  func.func @transform_0(%arg0: i32, %arg1: i32) -> (i32, i32, i32) {
    %c0_i32 = arith.constant 0 : i32
    %c0_i32_0 = arith.constant 0 : i32
    return %arg0, %arg1, %c0_i32 : i32, i32, i32
  }
  func.func @transform_1(%arg0: i32, %arg1: i32) -> (i32, i32, i32, i32) {
    %c0_i32 = arith.constant 0 : i32
    %c0_i32_0 = arith.constant 0 : i32
    %c0_i32_1 = arith.constant 0 : i32
    return %arg0, %c0_i32, %arg1, %c0_i32_0 : i32, i32, i32, i32
  }
}

</mosaic_0001>

<bundles_post_ra>
// kernel: _to_tensor_nhwc4.1
= control target key start
LH: loop header
LB: loop body
LE: loop exit
PB: predicated region body
PF: predicated region fallthrough
CT: control target
= control target key end

     0   :  { %vm25_vm0 = vcmask 130048   ;;  %s182_s0 = inlined_call_operand.vmem [shape: s32[2,16,16], index: 0, kind: input, shape index: {}]   ;;  %s183_s1 = inlined_call_operand.hbm [shape: f32[2,4,16,16], index: 1, kind: output, shape index: {}]  }
   0x1   :  { %v9_v0 = vld [vmem:[%s182_s0] sm:$0xff]  ;;  %v10_v1 = vld [vmem:[%s182_s0 + $0x8] sm:$0xff]  ;;  %v11_v2 = vld [vmem:[%s182_s0 + $0x10] sm:$0xff] }
   0x2   :  { %v13_v3 = vand.u32 255, %v9_v0  ;;  %v14_v4 = vand.u32 255, %v10_v1  ;;  %v15_v5 = vand.u32 255, %v11_v2  ;;  %v12_v6 = vld [vmem:[%s182_s0 + $0x18] sm:$0xff]  ;;  %v30_v7 = vshra.s32 %v9_v0, 8 }
   0x3   :  { %v16_v8 = vand.u32 255, %v12_v6  ;;  %v31_v9 = vshra.s32 %v10_v1, 8  ;;  %v32_v10 = vshra.s32 %v11_v2, 8  ;;  %v33_v11 = vshra.s32 %v12_v6, 8 }
   0x4   :  { %6 = vsyncpa [#allocation3], 0  ;;  %v17_v12 = vcvt.s32.f32 %v13_v3  ;;  %v18_v13 = vcvt.s32.f32 %v14_v4  ;;  %v19_v14 = vcvt.s32.f32 %v15_v5  ;;  %v34_v15 = vand.u32 255, %v30_v7  ;;  %s138_s0 = smov [#allocation2]  }
   0x5   :  { %v20_v16 = vcvt.s32.f32 %v16_v8  ;;  %v35_v17 = vand.u32 255, %v31_v9  ;;  %v36_v18 = vand.u32 255, %v32_v10  ;;  %v37_v19 = vand.u32 255, %v33_v11  ;;  %s98_s14 = sshll.u32 %s138_s0, 4  ;;  %s99_s14 = int_to_ptr.vmem [resolvable:$true] %s98_s14 }
   0x6   :  { %v21_v20 = vmul.f32 0.003921569, %v17_v12  ;;  %v22_v21 = vmul.f32 0.003921569, %v18_v13  ;;  %v23_v22 = vmul.f32 0.003921569, %v19_v14  ;;  %v38_v23 = vcvt.s32.f32 %v34_v15  ;;  %p121_p1 = scmp.lt.s32.totalorder %s99_s14, %s99_s14 }
   0x7   :  { %v24_v24 = vmul.f32 0.003921569, %v20_v16  ;;  %v39_v25 = vcvt.s32.f32 %v35_v17  ;;  %v40_v26 = vcvt.s32.f32 %v36_v18  ;;  %v41_v27 = vcvt.s32.f32 %v37_v19  ;;  %s116_s15 = scalar_lea.vmem %s99_s14, 2048 }
   0x8   :  { %26 = vst.msk [vmem:[#allocation2] sm:$0xff] %vm25_vm0, %v21_v20  ;;  %27 = vst.msk [vmem:[#allocation2 + $0x8] sm:$0xff] %vm25_vm0, %v22_v21  ;;  %v42_v28 = vmul.f32 0.003921569, %v38_v23  ;;  %v51_v29 = vshra.s32 %v9_v0, 16  ;;  %v52_v30 = vshra.s32 %v10_v1, 16  ;;  %p117_p0 = scmp.ne.s32.totalorder %s99_s14, %s116_s15  ;;  %p122_p2 = scmp.lt.s32.totalorder %s116_s15, %s116_s15 }
   0x9   :  { %28 = vst.msk [vmem:[#allocation2 + $0x40] sm:$0xff] %vm25_vm0, %v23_v22  ;;  %v53_v31 = vshra.s32 %v11_v2, 16  ;;  %29 = vst.msk [vmem:[#allocation2 + $0x48] sm:$0xff] %vm25_vm0, %v24_v24  ;;  %v43_v32 = vmul.f32 0.003921569, %v39_v25  ;;  %v54_v38 = vshra.s32 %v12_v6, 16 }
   0xa   :  { %v44_v33 = vmul.f32 0.003921569, %v40_v26  ;;  %v45_v34 = vmul.f32 0.003921569, %v41_v27  ;;  %47 = vst.msk [vmem:[#allocation2 + $0x10] sm:$0xff] %vm25_vm0, %v42_v28  ;;  %v55_v35 = vand.u32 255, %v51_v29  ;;  %p123_p3 = por %p122_p2, %p121_p1 }
   0xb   :  { %v56_v36 = vand.u32 255, %v52_v30  ;;  %v57_v37 = vand.u32 255, %v53_v31  ;;  %48 = vst.msk [vmem:[#allocation2 + $0x18] sm:$0xff] %vm25_vm0, %v43_v32  ;;  %v109_v39 = vshrl.u32 %v9_v0, 24  ;;  %v110_v40 = vshrl.u32 %v10_v1, 24 }
   0xc   :  { %49 = vst.msk [vmem:[#allocation2 + $0x50] sm:$0xff] %vm25_vm0, %v44_v33  ;;  %50 = vst.msk [vmem:[#allocation2 + $0x58] sm:$0xff] %vm25_vm0, %v45_v34  ;;  %v111_v41 = vshrl.u32 %v11_v2, 24  ;;  %v112_v42 = vshrl.u32 %v12_v6, 24  ;;  %v59_v43 = vcvt.s32.f32 %v55_v35  ;;  %v58_v46 = vand.u32 255, %v54_v38  ;;  %p124_p4 = pnand %p123_p3, %p117_p0 }
   0xd   :  { %v60_v44 = vcvt.s32.f32 %v56_v36  ;;  %v61_v45 = vcvt.s32.f32 %v57_v37  ;;  %v80_v47 = vcvt.s32.f32 %v109_v39  ;;  %v81_v48 = vcvt.s32.f32 %v110_v40 }
   0xe   :  { %v82_v49 = vcvt.s32.f32 %v111_v41  ;;  %v83_v50 = vcvt.s32.f32 %v112_v42  ;;  %v63_v51 = vmul.f32 0.003921569, %v59_v43  ;;  %v62_v54 = vcvt.s32.f32 %v58_v46 }
   0xf   :  { %v64_v52 = vmul.f32 0.003921569, %v60_v44  ;;  %v65_v53 = vmul.f32 0.003921569, %v61_v45  ;;  %v84_v55 = vmul.f32 0.003921569, %v80_v47 }
  0x10   :  { %v85_v56 = vmul.f32 0.003921569, %v81_v48  ;;  %v86_v57 = vmul.f32 0.003921569, %v82_v49  ;;  %68 = vst.msk [vmem:[#allocation2 + $0x20] sm:$0xff] %vm25_vm0, %v63_v51 }
  0x11   :  { %69 = vst.msk [vmem:[#allocation2 + $0x28] sm:$0xff] %vm25_vm0, %v64_v52  ;;  %70 = vst.msk [vmem:[#allocation2 + $0x60] sm:$0xff] %vm25_vm0, %v65_v53  ;;  %v66_v58 = vmul.f32 0.003921569, %v62_v54  ;;  %v87_v59 = vmul.f32 0.003921569, %v83_v50 }
  0x12   :  { %89 = vst.msk [vmem:[#allocation2 + $0x30] sm:$0xff] %vm25_vm0, %v84_v55  ;;  %90 = vst.msk [vmem:[#allocation2 + $0x38] sm:$0xff] %vm25_vm0, %v85_v56 }
  0x13   :  { %91 = vst.msk [vmem:[#allocation2 + $0x70] sm:$0xff] %vm25_vm0, %v86_v57  ;;  %71 = vst.msk [vmem:[#allocation2 + $0x68] sm:$0xff] %vm25_vm0, %v66_v58 }
  0x14   :  { %92 = vst.msk [vmem:[#allocation2 + $0x78] sm:$0xff] %vm25_vm0, %v87_v59 }
  0x15   :  { %127 = shalt.err (!%p124_p4)
}
  0x16   :  { %s139_s16 = smov 128   ;;  %s140_s17 = smov 8  }
  0x17   :  { %104 = dma.vmem_to_hbm [thread:$0]  %s99_s14, 2048, %s183_s1, [#allocation3], %s139_s16, %s139_s16, %s140_s17  }
  0x18   :  { %136 = dma.done.wait [#allocation3], 2048  }
  0x19   :  { %137 = vsyncadd [#allocation3], 4294965248 }
  0x1a   :  { %108 = vsyncpa [#allocation3], 1 }

</bundles_post_ra>
